<compile_context>
chip_gen: v7x
topology: tpu7x:2x2x1
jax: 0.10.0
libtpu: 0.0.40
codegen_flags: <defaults>
</compile_context>

<pallas_src>
import functools

import jax
import jax.numpy as jnp
from jax.experimental import pallas as pl
from jax.experimental.pallas import tpu as pltpu


def _round_up(a, b):
    return (a + b - 1) // b * b


def _int_pow(x, n):
    """x**n for static int n >= 1 via square-and-multiply (VALU only)."""
    n = int(n)
    result = None
    base = x
    while n > 0:
        if n & 1:
            result = base if result is None else result * base
        n >>= 1
        if n:
            base = base * base
    return result


def _gem_kernel(p_ref, x_ref, o_ref, *, eps, inv_hw, static_p, bf16_compute):
    # p_ref: SMEM (1, 1) learnable exponent (ignored when static_p is given)
    # x_ref: VMEM (TR, H*W) row tile (last block may contain garbage tail rows;
    #        those rows' outputs are sliced away by the wrapper)
    # o_ref: VMEM (1, 1, TR) lane-dense output row for this tile
    if static_p is not None:
        if bf16_compute:
            # Keep the repeated multiplies in bf16 (packed 16x128 vregs on
            # v6e/v7x); accumulate the spatial sum in f32.
            xc = jnp.maximum(x_ref[...], jnp.asarray(eps, x_ref.dtype))
            xp = _int_pow(xc, static_p)
            row_sum = jnp.sum(xp.astype(jnp.float32), axis=-1)      # (TR,)
        else:
            xc = jnp.maximum(x_ref[...].astype(jnp.float32), jnp.float32(eps))
            xp = _int_pow(xc, static_p)                              # VALU only
            row_sum = jnp.sum(xp, axis=-1)                           # (TR,)
        inv_p = jnp.float32(1.0 / float(static_p))
    else:
        p = p_ref[0, 0]
        xc = jnp.maximum(x_ref[...].astype(jnp.float32), jnp.float32(eps))
        xp = jnp.power(xc, p)                                        # EUP exp/log
        row_sum = jnp.sum(xp, axis=-1)                               # (TR,)
        inv_p = 1.0 / p

    mean = row_sum * jnp.float32(inv_hw)                             # avg pool
    y = jnp.power(mean, inv_p)                                       # ^(1/p), TR elems
    o_ref[0, 0, :] = y.astype(o_ref.dtype)


def _vmem_budgets():
    """(vmem_limit_bytes, per-input-buffer byte budget) for this chip."""
    try:
        cap = int(getattr(pltpu.get_tpu_info(), "vmem_capacity_bytes",
                          64 * 1024 * 1024))
    except Exception:
        cap = 64 * 1024 * 1024
    # v5e/v6e (128 MiB) -> 96 MiB scoped limit; v7x (64 MiB per TC) -> 48 MiB.
    vmem_limit = min(cap * 3 // 4, 96 * 1024 * 1024)
    # 2 double-buffered input tiles + in-kernel f32 working set + output must
    # fit with headroom: ~1/5 of the limit per input buffer (<= 12 MiB).
    per_buf = min(12 * 1024 * 1024, vmem_limit // 5)
    return int(vmem_limit), int(per_buf)


def _pick_row_tile(NC, HW, row_tile, per_buf_budget):
    if row_tile is not None:
        tr = max(8, (int(row_tile) // 8) * 8)
        return min(tr, NC)                       # == NC if tr would exceed it
    if NC <= 32:
        return NC                                # single block == full array dim
    # Budget on the lane-padded f32 compute footprint, not raw bytes.
    bytes_per_row = _round_up(HW, 128) * 4
    tr = per_buf_budget // bytes_per_row
    tr = max(32, (tr // 32) * 32)                # 32-row multiple: bf16/int8 safe
    # Keep >= 2 tiles so both v7x TensorCores get work ("parallel" grid axis).
    tr = min(tr, max(32, _round_up(-(-NC // 2), 32)))
    return min(tr, NC)


def gem_pallas(x, p, eps=1e-6, *, row_tile=None):
    """GeM pooling. x: (N, C, H, W) -> (N, C, 1, 1).

    `p` may be a Python int/float (static fast path, e.g. inference_p) or a
    JAX scalar/array (traced, learnable-parameter path).
    """
    N, C, H, W = x.shape
    NC, HW = N * C, H * W
    x2 = x.reshape(NC, HW)
    itemsize = x2.dtype.itemsize

    # Static integer exponent? (typical p=3 / inference_p=3 path)
    static_p = None
    if isinstance(p, (int, float)) and float(p) == int(p) and 1 <= int(p) <= 16:
        static_p = int(p)
    bf16_compute = static_p is not None and x2.dtype == jnp.bfloat16

    vmem_limit, per_buf = _vmem_budgets()
    tr = _pick_row_tile(NC, HW, row_tile, per_buf)
    n_tiles = (NC + tr - 1) // tr

    p2 = jnp.asarray(p, jnp.float32).reshape(1, 1)

    kernel = functools.partial(
        _gem_kernel, eps=float(eps), inv_hw=1.0 / float(HW),
        static_p=static_p, bf16_compute=bf16_compute)

    cost = pl.CostEstimate(
        flops=int(NC * HW * ((static_p or 2) + 1)),
        transcendentals=int((0 if static_p is not None else 2 * NC * HW)
                            + 2 * NC),
        bytes_accessed=int(NC * HW * itemsize + NC * itemsize),
    )

    out = pl.pallas_call(
        kernel,
        out_shape=jax.ShapeDtypeStruct((n_tiles, 1, tr), x.dtype),
        grid=(n_tiles,),
        in_specs=[
            pl.BlockSpec(memory_space=pltpu.SMEM),             # scalar p
            pl.BlockSpec((tr, HW), lambda i: (i, 0)),           # row tile of x
        ],
        out_specs=pl.BlockSpec((1, 1, tr), lambda i: (i, 0, 0)),  # lane-dense
        compiler_params=pltpu.CompilerParams(
            dimension_semantics=("parallel",),                  # 2 TCs on v7x
            vmem_limit_bytes=vmem_limit,
        ),
        cost_estimate=cost,
    )(p2, x2)

    # Tail rows of the last (partial) tile are garbage and are dropped here.
    return out.reshape(n_tiles * tr)[:NC].reshape(N, C, 1, 1)


class GeM:
    """Mirror of the PyTorch GeM module (deterministic init, no checkpoint)."""

    def __init__(self, p=3, inference_p=3, eps=1e-6):
        # Parameter(torch.ones(1) * p)
        self.p = jnp.ones((1,), jnp.float32) * p
        self.inference_p = inference_p
        self.eps = eps
        self.training = True

    def __call__(self, x):
        if self.training:
            return gem_pallas(x, self.p[0], eps=self.eps)          # traced p
        else:
            return gem_pallas(x, self.inference_p, eps=self.eps)   # static p


def _gem_ref(x, p, eps):
    # pure-JAX reference for correctness check
    xc = jnp.maximum(x.astype(jnp.float32), eps)
    xp = jnp.power(xc, p)
    mean = jnp.mean(xp, axis=(-2, -1), keepdims=True)
    return jnp.power(mean, 1.0 / p)


if __name__ == "__main__":
    key = jax.random.PRNGKey(0)
    N, C, H, W = 2, 4, 16, 16
    x = jax.random.uniform(key, (N, C, H, W), dtype=jnp.float32)

    mod = GeM(p=3, inference_p=3, eps=1e-6)

    # 1) Training path (traced learnable p), tiny NC -> single full block.
    y_train = jax.block_until_ready(mod(x))
    ref_train = _gem_ref(x, float(mod.p[0]), mod.eps)
    assert y_train.shape == (N, C, 1, 1), y_train.shape
    assert jnp.allclose(y_train, ref_train, rtol=1e-4, atol=1e-5), (
        float(jnp.max(jnp.abs(y_train - ref_train))))

    # 2) Inference path (static integer p -> square-and-multiply fast path).
    mod.training = False
    y_eval = jax.block_until_ready(mod(x))
    ref_eval = _gem_ref(x, float(mod.inference_p), mod.eps)
    assert jnp.allclose(y_eval, ref_eval, rtol=1e-4, atol=1e-5), (
        float(jnp.max(jnp.abs(y_eval - ref_eval))))

    # 3) Multi-tile grid with a partial tail block (no pad copy), traced p.
    x_tail = jax.random.normal(jax.random.PRNGKey(1), (3, 40, 8, 8), jnp.float32)
    y_tail = jax.block_until_ready(
        gem_pallas(x_tail, mod.p[0], eps=mod.eps, row_tile=64))
    ref_tail = _gem_ref(x_tail, float(mod.p[0]), mod.eps)
    assert y_tail.shape == (3, 40, 1, 1), y_tail.shape
    assert jnp.allclose(y_tail, ref_tail, rtol=1e-4, atol=1e-5), (
        float(jnp.max(jnp.abs(y_tail - ref_tail))))

    # 4) Canonical GeM shape (7x7 spatial), default budget-based tiling,
    #    static p, >= 2 tiles.
    x_7 = jax.random.uniform(jax.random.PRNGKey(2), (4, 64, 7, 7), jnp.float32)
    y_7 = jax.block_until_ready(gem_pallas(x_7, 3, eps=mod.eps))
    ref_7 = _gem_ref(x_7, 3.0, mod.eps)
    assert y_7.shape == (4, 64, 1, 1), y_7.shape
    assert jnp.allclose(y_7, ref_7, rtol=1e-4, atol=1e-5), (
        float(jnp.max(jnp.abs(y_7 - ref_7))))

    # 5) bf16 input, static p: bf16 multiplies + f32 accumulation.
    x_bf = jax.random.uniform(jax.random.PRNGKey(3), (2, 48, 7, 7),
                              dtype=jnp.float32).astype(jnp.bfloat16)
    y_bf = jax.block_until_ready(gem_pallas(x_bf, 3, eps=mod.eps))
    ref_bf = _gem_ref(x_bf.astype(jnp.float32), 3.0, mod.eps)
    assert y_bf.shape == (2, 48, 1, 1), y_bf.shape
    assert jnp.allclose(y_bf.astype(jnp.float32), ref_bf,
                        rtol=5e-2, atol=1e-2), (
        float(jnp.max(jnp.abs(y_bf.astype(jnp.float32) - ref_bf))))

    print("KERNEL_OK")
</pallas_src>

<mosaic_0001>
module attributes {stable_mosaic.version = 11 : i64} {
  func.func @_gem_kernel(%arg0: i32, %arg1: memref<1x1xf32, #tpu.memory_space<smem>>, %arg2: memref<8x256xf32, #tpu.memory_space<vmem>>, %arg3: memref<1x1x8xf32, #tpu.memory_space<vmem>>) attributes {dimension_semantics = [#tpu.dimension_semantics<parallel>], iteration_bounds = array<i64: 1>, scalar_prefetch = 0 : i64, scratch_operands = 0 : i64, tpu.core_type = #tpu.core_type<tc>, window_params = [{transform_indices = @transform_0, window_bounds = array<i64: 1, 1>}, {transform_indices = @transform_1, window_bounds = array<i64: 8, 256>}, {transform_indices = @transform_2, window_bounds = array<i64: 1, 1, 8>}]} {
    %c0 = arith.constant 0 : index
    %c0_0 = arith.constant 0 : index
    %0 = memref.load %arg1[%c0, %c0_0] : memref<1x1xf32, #tpu.memory_space<smem>>
    %c0_1 = arith.constant 0 : index
    %c0_2 = arith.constant 0 : index
    %1 = vector.load %arg2[%c0_1, %c0_2] : memref<8x256xf32, #tpu.memory_space<vmem>>, vector<8x256xf32>
    %cst = arith.constant 9.99999997E-7 : f32
    %2 = vector.broadcast %cst : f32 to vector<8x256xf32>
    %3 = arith.maximumf %1, %2 : vector<8x256xf32>
    %4 = vector.broadcast %0 : f32 to vector<8x256xf32>
    %5 = math.powf %3, %4 : vector<8x256xf32>
    %cst_3 = arith.constant dense<0.000000e+00> : vector<8xf32>
    %6 = vector.multi_reduction <add>, %5, %cst_3 [1] : vector<8x256xf32> to vector<8xf32>
    %cst_4 = arith.constant 1.000000e+00 : f32
    %7 = arith.divf %cst_4, %0 : f32
    %cst_5 = arith.constant 3.906250e-03 : f32
    %8 = vector.broadcast %cst_5 : f32 to vector<8xf32>
    %9 = arith.mulf %6, %8 : vector<8xf32>
    %10 = vector.broadcast %7 : f32 to vector<8xf32>
    %11 = math.powf %9, %10 : vector<8xf32>
    %c0_6 = arith.constant 0 : index
    %c0_7 = arith.constant 0 : index
    %c0_8 = arith.constant 0 : index
    %12 = vector.load %arg3[%c0_6, %c0_7, %c0_8] : memref<1x1x8xf32, #tpu.memory_space<vmem>>, vector<1x1x8xf32>
    %13 = vector.shape_cast %12 : vector<1x1x8xf32> to vector<8xf32>
    %14 = vector.shape_cast %11 : vector<8xf32> to vector<1x1x8xf32>
    tpu.vector_store %arg3[%c0_6, %c0_7, %c0_8], %14 {strides = array<i32>} : memref<1x1x8xf32, #tpu.memory_space<vmem>>, vector<1x1x8xf32>,
    return
  }
  func.func @transform_0(%arg0: i32) -> (i32, i32) {
    %c0_i32 = arith.constant 0 : i32
    %c0_i32_0 = arith.constant 0 : i32
    %c0_i32_1 = arith.constant 0 : i32
    return %c0_i32, %c0_i32_0 : i32, i32
  }
  func.func @transform_1(%arg0: i32) -> (i32, i32) {
    %c0_i32 = arith.constant 0 : i32
    %c0_i32_0 = arith.constant 0 : i32
    return %arg0, %c0_i32 : i32, i32
  }
  func.func @transform_2(%arg0: i32) -> (i32, i32, i32) {
    %c0_i32 = arith.constant 0 : i32
    %c0_i32_0 = arith.constant 0 : i32
    %c0_i32_1 = arith.constant 0 : i32
    return %arg0, %c0_i32, %c0_i32_0 : i32, i32, i32
  }
}

</mosaic_0001>

<bundles_post_ra>
// kernel: tpu_custom_call.1
= control target key start
LH: loop header
LB: loop body
LE: loop exit
PB: predicated region body
PF: predicated region fallthrough
CT: control target
= control target key end

     0   :  { %8 = vsyncpa [#allocation4], 0  ;;  %s548_s0 = inlined_call_operand.<no memory space> [shape: f32[1,1], index: 0, kind: input, shape index: {}]   ;;  %s549_s1 = inlined_call_operand.hbm [shape: f32[8,256], index: 1, kind: input, shape index: {}]   ;;  %s550_s2 = inlined_call_operand.hbm [shape: f32[1,1,8], index: 2, kind: output, shape index: {}]  }
   0x1   :  { %9 = vsyncpa [#allocation5], 0  ;;  %s291_s9 = smov [#allocation3]   ;;  %s243_s13 = scalar_lea.hbm %s549_s1, 256 }
   0x2   :  { %s18_s10 = sshll.u32 %s291_s9, 4  ;;  %p244_p0 = scmp.ne.s32.totalorder %s549_s1, %s243_s13  ;;  %s19_s10 = int_to_ptr.vmem [resolvable:$true] %s18_s10 }
   0x3   :  { %p247_p1 = scmp.lt.u32.totalorder %s243_s13, %s549_s1 }
   0x5   :  { %p249_p2 = pnand %p247_p1, %p244_p0 }
   0x7   :  { %252 = shalt.err (!%p249_p2)
}
   0x8   :  { %s253_s18 = scalar_lea.vmem %s19_s10, 256  ;;  %p258_p4 = scmp.lt.s32.totalorder %s19_s10, %s19_s10 }
   0x9   :  { %p254_p3 = scmp.ne.s32.totalorder %s19_s10, %s253_s18  ;;  %p259_p5 = scmp.lt.s32.totalorder %s253_s18, %s253_s18 }
   0xb   :  { %p260_p6 = por %p259_p5, %p258_p4 }
   0xd   :  { %p261_p7 = pnand %p260_p6, %p254_p3 }
   0xf   :  { %264 = shalt.err (!%p261_p7)
}
  0x10   :  { %21 = dma.hbm_to_vmem [thread:$0]  %s549_s1, 256, %s19_s10, [#allocation4]  }
  0x11   :  { %287 = dma.done.wait [#allocation4], 256  }
  0x12   :  { %288 = vsyncadd [#allocation4], 4294967040  ;;  %v325_v0 = vstv %s548_s0  ;;  %v26_v2 = vld [vmem:[#allocation3] sm:$0xff]  ;;  %v27_v3 = vld [vmem:[#allocation3 + $0x8] sm:$0xff]  ;;  %v292_v21 = vmov 2139095040   ;;  %v293_v27 = vmov 0  }
  0x13   :  { %v328_v1 = vand.u32 2147483647, %v325_v0  ;;  %229 = vrcp.f32 %v325_v0  ;;  %v331_v4 = vmax.f32 %v26_v2, 1e-06  ;;  %v333_v5 = vmax.f32 %v27_v3, 1e-06 }
  0x14   :  { %v76_v8 = vtrunc.f32 %v325_v0  ;;  %vm75_vm7 = vcmp.lt.f32.partialorder %v325_v0, 0  ;;  %s294_s1 = smov [#allocation6]  }
  0x15   :  { %v80_v6 = vtrunc.f32 %v328_v1  ;;  %v337_v7 = vand.u32 2147483647, %v331_v4  ;;  %v341_v9 = vand.u32 2147483647, %v333_v5  ;;  %vm551_vm0 = vcmp.eq.f32.partialorder %v328_v1, 2139095040  ;;  %s58_s23 = sshll.u32 %s294_s1, 4  ;;  %s59_s23 = int_to_ptr.vmem [resolvable:$true] %s58_s23 }
  0x16   :  { %vm77_vm1 = vcmp.ne.f32.partialorder %v325_v0, %v76_v8  ;;  %vm79_vm5 = vcmp.lt.f32.partialorder %v328_v1, 1266679808  ;;  %vm88_vm8 = vcmp.eq.f32.partialorder %v331_v4, 0  ;;  %vm140_vm11 = vcmp.eq.f32.partialorder %v333_v5, 0  ;;  %s265_s24 = scalar_lea.vmem %s59_s23, 16  ;;  %s269_s25 = scalar_lea.vmem %s59_s23, 32 }
  0x17   :  { %231 = vlog2.f32 %v337_v7  ;;  %v81_v10 = vcvt.f32.s32 %v80_v6  ;;  %vm349_vm2 = vmor %vm77_vm1, %vm551_vm0  ;;  %vm91_vm9 = vcmp.gt.f32.partialorder %v337_v7, 1065353216  ;;  %vm143_vm13 = vcmp.gt.f32.partialorder %v341_v9, 1065353216  ;;  %p266_p8 = scmp.ne.s32.totalorder %s59_s23, %s265_s24  ;;  %p270_p9 = scmp.lt.s32.totalorder %s59_s23, %s59_s23 }
  0x18   :  { %233 = vlog2.f32 %v341_v9  ;;  %vm84_vm4 = vmneg %vm349_vm2  ;;  %vm552_vm14 = vcmp.lt.f32.partialorder %v331_v4, 0  ;;  %v107_v22 = vsel %vm75_vm7, 0, %v292_v21  ;;  %vm90_vm0 = vcmp.lt.s32.totalorder %v331_v4, 0  ;;  %p271_p10 = scmp.lt.s32.totalorder %s269_s25, %s265_s24 }
  0x19   :  { %v82_v12 = vand.u32 1, %v81_v10  ;;  %vm370_vm12 = vmand %vm75_vm7, %vm88_vm8  ;;  %v108_v26 = vxor.u32 2147483648, %v107_v22  ;;  %v95_v28 = vsel %vm75_vm7, 2139095040, %v293_v27  ;;  %v43_v10 = vlaneseq }
  0x1a   :  { %vm378_vm15 = vmxor %vm75_vm7, %vm91_vm9  ;;  %p272_p11 = por %p271_p10, %p270_p9 }
  0x1b   :  { %vm83_vm3 = vcmp.eq.s32.totalorder %v82_v12, 1  ;;  %vm389_vm1 = vmand %vm75_vm7, %vm140_vm11  ;;  %v44_v18 = vand.u32 127, %v43_v10  ;;  %v46_v19 = vshrl.u32 %v43_v10, 7 }
  0x1c   :  { %vm85_vm6 = vmand %vm83_vm3, %vm84_vm4  ;;  %p273_p12 = pnand %p272_p11, %p266_p8 }
  0x1d   :  { %v230_v11 = vpop.eup %229  ;;  %vm361_vm10 = vmand %vm79_vm5, %vm85_vm6  ;;  %vm553_vm5 = vcmp.lt.f32.partialorder %v333_v5, 0  ;;  %v47_v25 = vsub.s32 %v44_v18, %v46_v19 }
  0x1e   :  { %171 = vpush %v230_v11  ;;  %vm395_vm3 = vmxor %vm75_vm7, %vm143_vm13  ;;  %vm73_vm13 = vcmp.eq.f32.partialorder %v325_v0, 0  ;;  %vm142_vm7 = vcmp.lt.s32.totalorder %v333_v5, 0  ;;  %v109_v34 = vsel %vm361_vm10, %v108_v26, %v107_v22 }
  0x1f   :  { %vm403_vm4 = vmand %vm552_vm14, %vm349_vm2  ;;  %vm113_vm14 = vcmp.ne.f32.partialorder %v325_v0, %v325_v0 }
  0x20   :  { %vm102_vm6 = vmor %vm370_vm12, %vm378_vm15  ;;  %vm104_vm15 = vcmp.eq.f32.partialorder %v331_v4, 3212836864 }
  0x21   :  { %v232_v14 = vpop.eup %231  ;;  %vm154_vm9 = vmor %vm389_vm1, %vm395_vm3  ;;  %v103_v31 = vsel %vm102_vm6, 2139095040, %v293_v27  ;;  %vm112_vm1 = vcmp.ne.f32.partialorder %v331_v4, %v331_v4  ;;  %vm89_vm3 = vcmp.eq.f32.partialorder %v331_v4, 1065353216  ;;  %vm92_vm6 = vcmp.eq.f32.partialorder %v337_v7, 2139095040 }
  0x22   :  { %v234_v15 = vpop.eup %233  ;;  %v69_v16 = vmul.f32 %v232_v14, %v325_v0  ;;  %vm427_vm12 = vmand %vm553_vm5, %vm349_vm2  ;;  %v155_v35 = vsel %vm154_vm9, 2139095040, %v293_v27  ;;  %vm156_vm2 = vcmp.eq.f32.partialorder %v333_v5, 3212836864  ;;  %v105_v39 = vsel %vm104_vm15, 1065353216, %v103_v31 }
  0x23   :  { %v121_v17 = vmul.f32 %v234_v15, %v325_v0  ;;  %vm97_vm5 = vmand %vm90_vm0, %vm361_vm10  ;;  %vm164_vm9 = vcmp.ne.f32.partialorder %v333_v5, %v333_v5  ;;  %v157_v44 = vsel %vm156_vm2, 1065353216, %v155_v35  ;;  %vm573_vm15 = vcmp.lt.f32.partialorder %v333_v5, 0 }
  0x24   :  { %235 = vpow2.f32 %v69_v16  ;;  %vm466_vm0 = vmor %vm112_vm1, %vm113_vm14  ;;  %v162_v46 = vsel %vm573_vm15, %v109_v34, %v107_v22  ;;  %vm574_vm1 = vcmp.eq.f32.partialorder %v328_v1, 2139095040 }
  0x25   :  { %237 = vpow2.f32 %v121_v17  ;;  %vm575_vm2 = vmmov %vm574_vm1 }
  0x2e   :  { %v236_v30 = vpop.eup %235 }
  0x2f   :  { %v238_v32 = vpop.eup %237  ;;  %v94_v33 = vsel %vm403_vm4, 2143289344, %v236_v30  ;;  %vm149_vm4 = vmand %vm142_vm7, %vm361_vm10 }
  0x30   :  { %v96_v36 = vsel %vm88_vm8, %v95_v28, %v94_v33  ;;  %v146_v37 = vsel %vm427_vm12, 2143289344, %v238_v32  ;;  %vm570_vm8 = vcmp.lt.f32.partialorder %v331_v4, 0  ;;  %vm116_vm10 = vmor %vm89_vm3, %vm73_vm13  ;;  %vm144_vm12 = vcmp.eq.f32.partialorder %v341_v9, 2139095040 }
  0x31   :  { %v98_v38 = vxor.u32 2147483648, %v96_v36  ;;  %v148_v40 = vsel %vm140_vm11, %v95_v28, %v146_v37  ;;  %v110_v41 = vsel %vm570_vm8, %v109_v34, %v107_v22  ;;  %vm141_vm11 = vcmp.eq.f32.partialorder %v333_v5, 1065353216  ;;  %vm166_vm7 = vmor %vm164_vm9, %vm113_vm14 }
  0x32   :  { %v150_v43 = vxor.u32 2147483648, %v148_v40  ;;  %vm168_vm3 = vmor %vm141_vm11, %vm73_vm13 }
  0x33   :  { %v99_v45 = vsel %vm97_vm5, %v98_v38, %v96_v36  ;;  %vm74_vm5 = vcmp.eq.f32.partialorder %v325_v0, 1065353216 }
  0x34   :  { %v106_v47 = vsel %vm574_vm1, %v105_v39, %v99_v45  ;;  %v151_v48 = vsel %vm149_vm4, %v150_v43, %v148_v40 }
  0x35   :  { %v111_v49 = vsel %vm92_vm6, %v110_v41, %v106_v47  ;;  %v158_v50 = vsel %vm575_vm2, %v157_v44, %v151_v48 }
  0x36   :  { %v115_v51 = vsel %vm466_vm0, 2143289344, %v111_v49  ;;  %v163_v52 = vsel %vm144_vm12, %v162_v46, %v158_v50 }
  0x37   :  { %v117_v53 = vsel %vm116_vm10, 1065353216, %v115_v51  ;;  %v167_v54 = vsel %vm166_vm7, 2143289344, %v163_v52 }
  0x38   :  { %v118_v55 = vsel %vm74_vm5, %v331_v4, %v117_v53  ;;  %v169_v56 = vsel %vm168_vm3, 1065353216, %v167_v54 }
  0x39   :  { %v170_v57 = vsel %vm74_vm5, %v333_v5, %v169_v56 }
  0x3a   :  { %v33_v58 = vadd.f32 %v170_v57, %v118_v55 }
  0x3c   :  { %34 = vadd.xlane.f32.xlu0 %v33_v58 }
  0x4f   :  { %s172_s0 = spop %171 }
  0x50   :  { %v494_v59 = vstv %s172_s0 }
  0x51   :  { %v177_v62 = vand.u32 2147483647, %v494_v59  ;;  %v182_v1 = vtrunc.f32 %v494_v59  ;;  %vm181_vm8 = vcmp.lt.f32.partialorder %v494_v59, 0 }
  0x52   :  { %v213_v7 = vsel %vm181_vm8, 0, %v292_v21  ;;  %v201_v12 = vsel %vm181_vm8, 2139095040, %v293_v27 }
  0x53   :  { %v186_v0 = vtrunc.f32 %v177_v62  ;;  %vm183_vm14 = vcmp.ne.f32.partialorder %v494_v59, %v182_v1  ;;  %vm178_vm13 = vcmp.eq.f32.partialorder %v177_v62, 2139095040  ;;  %vm185_vm11 = vcmp.lt.f32.partialorder %v177_v62, 1266679808 }
  0x54   :  { %vm501_vm6 = vmor %vm183_vm14, %vm178_vm13  ;;  %v214_v9 = vxor.u32 2147483648, %v213_v7 }
  0x55   :  { %v187_v2 = vcvt.f32.s32 %v186_v0  ;;  %vm190_vm9 = vmneg %vm501_vm6 }
  0x57   :  { %v188_v4 = vand.u32 1, %v187_v2 }
  0x59   :  { %vm189_vm4 = vcmp.eq.s32.totalorder %v188_v4, 1 }
  0x5a   :  { %vm191_vm10 = vmand %vm189_vm4, %vm190_vm9 }
  0x5b   :  { %vm513_vm1 = vmand %vm185_vm11, %vm191_vm10 }
  0x5c   :  { %v215_v17 = vsel %vm513_vm1, %v214_v9, %v213_v7 }
  0xc9   :  { %v35_v60 = vpop.xlane.xlu0 %34 }
  0xca   :  { %v39_v61 = vmul.f32 0.00390625, %v35_v60 }
  0xcc   :  { %v173_v63 = vand.u32 2147483647, %v39_v61  ;;  %vm194_vm12 = vcmp.eq.f32.partialorder %v39_v61, 0  ;;  %vm193_vm7 = vcmp.lt.f32.partialorder %v39_v61, 0  ;;  %vm196_vm14 = vcmp.lt.s32.totalorder %v39_v61, 0 }
  0xcd   :  { %vm206_vm5 = vmand %vm181_vm8, %vm194_vm12  ;;  %vm210_vm9 = vcmp.eq.f32.partialorder %v39_v61, 3212836864  ;;  %vm195_vm11 = vcmp.eq.f32.partialorder %v39_v61, 1065353216  ;;  %v216_v23 = vsel %vm193_vm7, %v215_v17, %v213_v7 }
  0xce   :  { %239 = vlog2.f32 %v173_v63  ;;  %vm197_vm0 = vcmp.gt.f32.partialorder %v173_v63, 1065353216  ;;  %vm199_vm3 = vmand %vm193_vm7, %vm501_vm6  ;;  %vm218_vm6 = vcmp.ne.f32.partialorder %v39_v61, %v39_v61  ;;  %vm198_vm10 = vcmp.eq.f32.partialorder %v173_v63, 2139095040 }
  0xcf   :  { %vm207_vm15 = vmxor %vm181_vm8, %vm197_vm0  ;;  %vm219_vm0 = vcmp.ne.f32.partialorder %v494_v59, %v494_v59  ;;  %vm179_vm8 = vcmp.eq.f32.partialorder %v494_v59, 0 }
  0xd0   :  { %vm208_vm2 = vmor %vm206_vm5, %vm207_vm15  ;;  %vm50_vm5 = vcmask 57344  }
  0xd1   :  { %v209_v15 = vsel %vm208_vm2, 2139095040, %v293_v27  ;;  %vm203_vm4 = vmand %vm196_vm14, %vm513_vm1  ;;  %vm180_vm1 = vcmp.eq.f32.partialorder %v494_v59, 1065353216 }
  0xd2   :  { %v211_v21 = vsel %vm210_vm9, 1065353216, %v209_v15  ;;  %vm222_vm15 = vmor %vm195_vm11, %vm179_vm8 }
  0xd8   :  { %v240_v3 = vpop.eup %239 }
  0xd9   :  { %v175_v5 = vmul.f32 %v240_v3, %v494_v59 }
  0xdb   :  { %241 = vpow2.f32 %v175_v5 }
  0xe5   :  { %v242_v11 = vpop.eup %241 }
  0xe6   :  { %v200_v13 = vsel %vm199_vm3, 2143289344, %v242_v11 }
  0xe7   :  { %v202_v14 = vsel %vm194_vm12, %v201_v12, %v200_v13  ;;  %vm220_vm12 = vmor %vm218_vm6, %vm219_vm0 }
  0xe8   :  { %v204_v16 = vxor.u32 2147483648, %v202_v14 }
  0xea   :  { %v205_v20 = vsel %vm203_vm4, %v204_v16, %v202_v14 }
  0xeb   :  { %v212_v22 = vsel %vm178_vm13, %v211_v21, %v205_v20 }
  0xec   :  { %v217_v24 = vsel %vm198_vm10, %v216_v23, %v212_v22 }
  0xed   :  { %v221_v26 = vsel %vm220_vm12, 2143289344, %v217_v24 }
  0xee   :  { %v223_v27 = vsel %vm222_vm15, 1065353216, %v221_v26 }
  0xef   :  { %v224_v28 = vsel %vm180_vm1, %v39_v61, %v223_v27 }
  0xf0   :  { %v48_v29 = vrot.slane %v224_v28, %v47_v25 }
  0xf2   :  { %51 = vst.msk [vmem:[#allocation6] sm:$0x1] %vm50_vm5, %v48_v29 }
  0xf3   :  { %276 = shalt.err (!%p273_p12)
}
  0xf4   :  { %s277_s28 = scalar_lea.hbm %s550_s2, 16 }
  0xf5   :  { %p278_p13 = scmp.ne.s32.totalorder %s550_s2, %s277_s28  ;;  %p281_p0 = scmp.lt.u32.totalorder %s277_s28, %s550_s2 }
  0xf7   :  { %p283_p1 = pnand %p281_p0, %p278_p13 }
  0xf9   :  { %286 = shalt.err (!%p283_p1)
}
  0xfa   :  { %61 = dma.vmem_to_hbm [thread:$0]  %s59_s23, 16, %s550_s2, [#allocation5]  }
  0xfb   :  { %289 = dma.done.wait [#allocation5], 16  }
  0xfc   :  { %290 = vsyncadd [#allocation5], 4294967280 }
  0xfd   :  { %65 = vsyncpa [#allocation4], 1 }
  0xfe   :  { %66 = vsyncpa [#allocation5], 1 }

</bundles_post_ra>
